<compile_context>
chip_gen: v7x
topology: tpu7x:2x2x1
jax: 0.10.0
libtpu: 0.0.40
codegen_flags: <defaults>
</compile_context>

<pallas_src>
import functools

import jax
import jax.numpy as jnp
from jax.experimental import pallas as pl
from jax.experimental.pallas import tpu as pltpu


_LANE = 128      # minormost (lane) tile width
_SUBLANE = 8     # second-minor (sublane) tile width


def _round_up(x, n):
    return ((x + n - 1) // n) * n


def _vmem_budget():
    """(max output lanes per block, max output rows per block) from chip VMEM."""
    cap = None
    try:
        cap = pltpu.get_tpu_info().vmem_capacity_bytes
    except Exception:  # unknown chip / older API -> stay conservative
        cap = None
    if cap is not None and cap >= 100 * 1024 * 1024:   # v5e / v6e: 128 MiB VMEM
        return 2048, 512
    return 1024, 256                                   # v7x (64 MiB) or unknown


def _dwconv_relu_kernel(xe_ref, xo_ref, *rest, K, m, TLO, halo_e, halo_o):
    """Depthwise strided conv + bias + ReLU on one (rows x lanes) tile.

    xe_ref / xo_ref : (RB_in, W)    even / odd phase of the (padded) input
    [halo refs]     : (RB_in, 128)  right-halo blocks, only for phases needing them
    w_ref           : (RB_out, K)   per-output-row taps
    b_ref           : (RB_out, 1)   bias
    o_ref           : (RB_out, TLO)
    """
    idx = 0
    xe = xe_ref[...]
    xo = xo_ref[...]
    if halo_e:
        xe = jnp.concatenate([xe, rest[idx][...]], axis=1)
        idx += 1
    if halo_o:
        xo = jnp.concatenate([xo, rest[idx][...]], axis=1)
        idx += 1
    w_ref, b_ref, o_ref = rest[idx], rest[idx + 1], rest[idx + 2]

    rows_in = xe_ref.shape[0]
    rows_out = o_ref.shape[0]
    w = w_ref[...].astype(jnp.float32)                       # (rows_out, K)

    if m == 1:
        # Bias broadcast once; fp32 accumulation; K static -> unrolled taps.
        acc = jnp.broadcast_to(b_ref[...].astype(jnp.float32), (rows_out, TLO))
        for k in range(K):
            src = xe if (k % 2 == 0) else xo
            off = k // 2
            tap = src[:, off:off + TLO].astype(jnp.float32)   # unit-stride lane slice
            acc = acc + w[:, k:k + 1] * tap
        o_ref[...] = jnp.maximum(acc, 0.0).astype(o_ref.dtype)
    else:
        # Grouped conv without jnp.repeat: accumulate per (input-row, subgroup).
        wg = w.reshape(rows_in, m, K)
        bg = b_ref[...].astype(jnp.float32).reshape(rows_in, m, 1)
        acc = jnp.broadcast_to(bg, (rows_in, m, TLO))
        for k in range(K):
            src = xe if (k % 2 == 0) else xo
            off = k // 2
            tap = src[:, off:off + TLO].astype(jnp.float32)   # (rows_in, TLO)
            acc = acc + wg[:, :, k:k + 1] * tap[:, None, :]
        o_ref[...] = jnp.maximum(acc, 0.0).reshape(rows_out, TLO).astype(o_ref.dtype)


def downsample_conv(x, weight, bias, *, kernel):
    """Depthwise Conv1d(stride=2, padding=kernel//2, groups=C_in) + ReLU. NCL layout."""
    N, C_in, L = x.shape
    C_out = weight.shape[0]
    K = kernel
    assert weight.shape == (C_out, 1, K)
    assert bias.shape == (C_out,)
    assert C_out % C_in == 0, "groups=in_feature requires out_feature % in_feature == 0"
    assert 1 <= K < 2 * _LANE
    m = C_out // C_in
    pad = K // 2
    assert L + 2 * pad >= K
    L_out = (L + 2 * pad - K) // 2 + 1

    R_in = N * C_in
    R_out = N * C_out

    max_lane_tile, max_row_tile = _vmem_budget()

    # ---- row tiling --------------------------------------------------------
    max_rb_in = max(_SUBLANE, max_row_tile // m)
    if R_in >= _SUBLANE:
        RB_in = min((R_in // _SUBLANE) * _SUBLANE, max_rb_in)
    else:
        RB_in = R_in                      # tiny case: full-dim row block
    RB_out = RB_in * m
    NRB = pl.cdiv(R_out, RB_out)

    # ---- lane (output length) tiling --------------------------------------
    TLO = max_lane_tile if L_out > max_lane_tile else L_out
    NLB = pl.cdiv(L_out, TLO)

    # v7x has 2 TensorCores: make sure there are >= 2 grid blocks when possible.
    if NRB * NLB < 2:
        if R_in >= 2 * _SUBLANE:
            RB_in = _round_up(max(RB_in // 2, _SUBLANE), _SUBLANE)
            RB_out = RB_in * m
            NRB = pl.cdiv(R_out, RB_out)
        elif L_out >= 2 * _LANE:
            TLO = _round_up(pl.cdiv(L_out, 2), _LANE)
            NLB = pl.cdiv(L_out, TLO)

    has_halo = NLB > 1
    evens = [k // 2 for k in range(K) if k % 2 == 0]
    odds = [k // 2 for k in range(K) if k % 2 == 1]
    max_off_e = max(evens) if evens else 0
    max_off_o = max(odds) if odds else 0
    halo_e = has_halo and max_off_e > 0
    halo_o = has_halo and max_off_o > 0

    if has_halo:
        TLI = TLO                          # per-block input phase width
        LP = NLB * TLO + _LANE             # phase array width (128-aligned halo tail)
    else:
        TLI = _round_up(L_out + pad, _LANE)
        LP = TLI

    # ---- wrapper glue (review Option B): one strided slice + small pad per phase
    x2 = x.reshape(R_in, L)                # free reshape

    def make_phase(q):
        # P[j] = x_padded[2j + q] = x[2j + q - pad], zero outside [0, L).
        s = q - pad
        nl = max(0, (-s + 1) // 2)         # leading zero columns (<= (pad+1)//2)
        first = 2 * nl + s                 # first in-range source column (0 or 1)
        core = x2[:, first::2]             # single strided slice straight from x
        nr = LP - nl - core.shape[1]
        assert nr >= 0
        return jnp.pad(core, ((0, 0), (nl, nr)))

    x_even = make_phase(0)
    x_odd = make_phase(1)

    # Per-output-row taps / bias (tiny arrays; row = n*C_out + c_out).
    w_rows = jnp.tile(weight[:, 0, :], (N, 1))            # (R_out, K)
    b_rows = jnp.tile(bias.reshape(C_out, 1), (N, 1))     # (R_out, 1)

    hstep = TLO // _LANE if has_halo else 0

    in_specs = [
        pl.BlockSpec((RB_in, TLI), lambda r, l: (r, l)),
        pl.BlockSpec((RB_in, TLI), lambda r, l: (r, l)),
    ]
    args = [x_even, x_odd]
    if halo_e:
        in_specs.append(pl.BlockSpec((RB_in, _LANE), lambda r, l: (r, (l + 1) * hstep)))
        args.append(x_even)
    if halo_o:
        in_specs.append(pl.BlockSpec((RB_in, _LANE), lambda r, l: (r, (l + 1) * hstep)))
        args.append(x_odd)
    in_specs += [
        pl.BlockSpec((RB_out, K), lambda r, l: (r, 0)),
        pl.BlockSpec((RB_out, 1), lambda r, l: (r, 0)),
    ]
    args += [w_rows, b_rows]

    kern = functools.partial(_dwconv_relu_kernel, K=K, m=m, TLO=TLO,
                             halo_e=halo_e, halo_o=halo_o)

    # VMEM budget: double-buffered blocks + in-kernel fp32 temporaries + headroom,
    # clamped so it never exceeds what the smallest-VMEM chip (v7x) can take.
    itemsize = jnp.dtype(x.dtype).itemsize
    per_step = (2 * RB_in * TLI + (int(halo_e) + int(halo_o)) * RB_in * _LANE) * itemsize
    per_step += RB_out * TLO * itemsize + RB_out * (K + 1) * 4
    temporaries = 2 * RB_in * (TLO + _LANE) * 4 + 2 * RB_out * TLO * 4
    vmem_limit = max(32 * 1024 * 1024,
                     min(int(2 * per_step * 1.5 + temporaries), 100 * 1024 * 1024))

    out2 = pl.pallas_call(
        kern,
        out_shape=jax.ShapeDtypeStruct((R_out, L_out), x.dtype),
        grid=(NRB, NLB),
        in_specs=in_specs,
        out_specs=pl.BlockSpec((RB_out, TLO), lambda r, l: (r, l)),
        compiler_params=pltpu.CompilerParams(
            dimension_semantics=("parallel", "parallel"),
            vmem_limit_bytes=vmem_limit),
    )(*args)
    return out2.reshape(N, C_out, L_out)


def _reference(x, weight, bias, *, kernel):
    C_in = x.shape[1]
    pad = kernel // 2
    y = jax.lax.conv_general_dilated(
        x, weight, window_strides=(2,), padding=[(pad, pad)],
        dimension_numbers=("NCH", "OIH", "NCH"), feature_group_count=C_in)
    y = y + bias[None, :, None]
    return jnp.maximum(y, 0.0)


if __name__ == "__main__":
    key = jax.random.PRNGKey(0)
    k_x, k_w, k_x2, k_w2 = jax.random.split(key, 4)

    # Case 1: small shapes consistent with the module (in_feature = out_feature = 4).
    N, C_in, L, K = 2, 4, 16, 3
    C_out = C_in  # groups=in_feature requires out_feature % in_feature == 0
    x = jax.random.normal(k_x, (N, C_in, L), dtype=jnp.float32)
    fan_in, fan_out = 1 * K, (C_out // C_in) * K
    bound = (6.0 / (fan_in + fan_out)) ** 0.5
    weight = jax.random.uniform(k_w, (C_out, 1, K), jnp.float32, -bound, bound)
    bias = jnp.zeros((C_out,), jnp.float32)

    out = jax.block_until_ready(downsample_conv(x, weight, bias, kernel=K))
    ref = _reference(x, weight, bias, kernel=K)
    assert out.shape == ref.shape
    assert jnp.allclose(out, ref, atol=1e-5, rtol=1e-5)

    # Case 2: exercises the multi-row-block grid (>= 2 blocks for v7x's 2 TCs) and K=5.
    N2, C2, L2, K2 = 2, 16, 512, 5
    x2 = jax.random.normal(k_x2, (N2, C2, L2), dtype=jnp.float32)
    w2 = jax.random.uniform(k_w2, (C2, 1, K2), jnp.float32, -0.5, 0.5)
    b2 = jnp.linspace(-0.1, 0.1, C2, dtype=jnp.float32)
    out2 = jax.block_until_ready(downsample_conv(x2, w2, b2, kernel=K2))
    ref2 = _reference(x2, w2, b2, kernel=K2)
    assert out2.shape == ref2.shape
    assert jnp.allclose(out2, ref2, atol=1e-4, rtol=1e-4)

    print("KERNEL_OK")
</pallas_src>

<mosaic_0001>
module attributes {stable_mosaic.version = 11 : i64} {
  func.func @_dwconv_relu_kernel(%arg0: i32, %arg1: i32, %arg2: memref<8x128xf32, #tpu.memory_space<vmem>>, %arg3: memref<8x128xf32, #tpu.memory_space<vmem>>, %arg4: memref<8x3xf32, #tpu.memory_space<vmem>>, %arg5: memref<8x1xf32, #tpu.memory_space<vmem>>, %arg6: memref<8x8xf32, #tpu.memory_space<vmem>>) attributes {dimension_semantics = [#tpu.dimension_semantics<parallel>, #tpu.dimension_semantics<parallel>], iteration_bounds = array<i64: 1, 1>, scalar_prefetch = 0 : i64, scratch_operands = 0 : i64, tpu.core_type = #tpu.core_type<tc>, window_params = [{transform_indices = @transform_0, window_bounds = array<i64: 8, 128>}, {transform_indices = @transform_1, window_bounds = array<i64: 8, 128>}, {transform_indices = @transform_2, window_bounds = array<i64: 8, 3>}, {transform_indices = @transform_3, window_bounds = array<i64: 8, 1>}, {transform_indices = @transform_4, window_bounds = array<i64: 8, 8>}]} {
    %c0 = arith.constant 0 : index
    %c0_0 = arith.constant 0 : index
    %0 = vector.load %arg2[%c0, %c0_0] : memref<8x128xf32, #tpu.memory_space<vmem>>, vector<8x128xf32>
    %c0_1 = arith.constant 0 : index
    %c0_2 = arith.constant 0 : index
    %1 = vector.load %arg3[%c0_1, %c0_2] : memref<8x128xf32, #tpu.memory_space<vmem>>, vector<8x128xf32>
    %c0_3 = arith.constant 0 : index
    %c0_4 = arith.constant 0 : index
    %2 = vector.load %arg4[%c0_3, %c0_4] : memref<8x3xf32, #tpu.memory_space<vmem>>, vector<8x3xf32>
    %c0_5 = arith.constant 0 : index
    %c0_6 = arith.constant 0 : index
    %3 = vector.load %arg5[%c0_5, %c0_6] : memref<8x1xf32, #tpu.memory_space<vmem>>, vector<8x1xf32>
    %4 = vector.shape_cast %3 : vector<8x1xf32> to vector<8x1xf32>
    %5 = vector.broadcast %4 : vector<8x1xf32> to vector<8x8xf32>
    %6 = vector.extract_strided_slice %0 {offsets = [0, 0], sizes = [8, 8], strides = [1, 1]} : vector<8x128xf32> to vector<8x8xf32>
    %7 = vector.extract_strided_slice %2 {offsets = [0, 0], sizes = [8, 1], strides = [1, 1]} : vector<8x3xf32> to vector<8x1xf32>
    %8 = vector.broadcast %7 : vector<8x1xf32> to vector<8x8xf32>
    %9 = arith.mulf %8, %6 : vector<8x8xf32>
    %10 = arith.addf %5, %9 : vector<8x8xf32>
    %11 = vector.extract_strided_slice %1 {offsets = [0, 0], sizes = [8, 8], strides = [1, 1]} : vector<8x128xf32> to vector<8x8xf32>
    %12 = vector.extract_strided_slice %2 {offsets = [0, 1], sizes = [8, 1], strides = [1, 1]} : vector<8x3xf32> to vector<8x1xf32>
    %13 = vector.broadcast %12 : vector<8x1xf32> to vector<8x8xf32>
    %14 = arith.mulf %13, %11 : vector<8x8xf32>
    %15 = arith.addf %10, %14 : vector<8x8xf32>
    %16 = vector.extract_strided_slice %0 {offsets = [0, 1], sizes = [8, 8], strides = [1, 1]} : vector<8x128xf32> to vector<8x8xf32>
    %17 = vector.extract_strided_slice %2 {offsets = [0, 2], sizes = [8, 1], strides = [1, 1]} : vector<8x3xf32> to vector<8x1xf32>
    %18 = vector.broadcast %17 : vector<8x1xf32> to vector<8x8xf32>
    %19 = arith.mulf %18, %16 : vector<8x8xf32>
    %20 = arith.addf %15, %19 : vector<8x8xf32>
    %cst = arith.constant 0.000000e+00 : f32
    %21 = vector.broadcast %cst : f32 to vector<8x8xf32>
    %22 = arith.maximumf %20, %21 : vector<8x8xf32>
    %c0_7 = arith.constant 0 : index
    %c0_8 = arith.constant 0 : index
    %23 = vector.load %arg6[%c0_7, %c0_8] : memref<8x8xf32, #tpu.memory_space<vmem>>, vector<8x8xf32>
    tpu.vector_store %arg6[%c0_7, %c0_8], %22 {strides = array<i32>} : memref<8x8xf32, #tpu.memory_space<vmem>>, vector<8x8xf32>,
    return
  }
  func.func @transform_0(%arg0: i32, %arg1: i32) -> (i32, i32) {
    %c0_i32 = arith.constant 0 : i32
    return %arg0, %arg1 : i32, i32
  }
  func.func @transform_1(%arg0: i32, %arg1: i32) -> (i32, i32) {
    %c0_i32 = arith.constant 0 : i32
    return %arg0, %arg1 : i32, i32
  }
  func.func @transform_2(%arg0: i32, %arg1: i32) -> (i32, i32) {
    %c0_i32 = arith.constant 0 : i32
    %c0_i32_0 = arith.constant 0 : i32
    return %arg0, %c0_i32 : i32, i32
  }
  func.func @transform_3(%arg0: i32, %arg1: i32) -> (i32, i32) {
    %c0_i32 = arith.constant 0 : i32
    %c0_i32_0 = arith.constant 0 : i32
    return %arg0, %c0_i32 : i32, i32
  }
  func.func @transform_4(%arg0: i32, %arg1: i32) -> (i32, i32) {
    %c0_i32 = arith.constant 0 : i32
    return %arg0, %arg1 : i32, i32
  }
}

</mosaic_0001>

<bundles_post_ra>
// kernel: tpu_custom_call.1
= control target key start
LH: loop header
LB: loop body
LE: loop exit
PB: predicated region body
PF: predicated region fallthrough
CT: control target
= control target key end

     0   :  { %v101_v2 = vmov 2   ;;  %v102_v3 = vmov 0   ;;  %s155_s0 = inlined_call_operand.vmem [shape: f32[8,128], index: 0, kind: input, shape index: {}]   ;;  %s156_s1 = inlined_call_operand.vmem [shape: f32[8,128], index: 1, kind: input, shape index: {}]   ;;  %s157_s2 = inlined_call_operand.vmem [shape: f32[8,3], index: 2, kind: input, shape index: {}]   ;;  %s158_s3 = inlined_call_operand.vmem [shape: f32[8,1], index: 3, kind: input, shape index: {}]   ;;  %s159_s4 = inlined_call_operand.hbm [shape: f32[8,8], index: 4, kind: output, shape index: {}]  }
   0x1   :  { %v20_v0 = vld [vmem:[%s157_s2] sm:$0xff]  ;;  %72 = vset.pattern.permute.xlu0 %v101_v2  ;;  %74 = vset.pattern.permute.xlu1 %v102_v3 }
   0x2   :  { %v21_v1 = vld [vmem:[%s158_s3] sm:$0xff] }
   0x3   :  { %9 = vsyncpa [#allocation3], 0  ;;  %41 = vperm.xlu0 %72, %v20_v0   ;;  %24 = vperm.xlu1 %74, %v21_v1   ;;  %v103_v4 = vmov 1   ;;  %v18_v5 = vld [vmem:[%s155_s0] sm:$0xff]  ;;  %s104_s2 = smov 127   ;;  %s105_s22 = smov [#allocation2]  }
   0x4   :  { %v19_v12 = vld [vmem:[%s156_s1] sm:$0xff]  ;;  %s59_s23 = sshll.u32 %s105_s22, 4  ;;  %vm51_vm0 = vcmask 64512   ;;  %s60_s23 = int_to_ptr.vmem [resolvable:$true] %s59_s23 }
   0x5   :  { %s77_s0 = scalar_lea.vmem %s60_s23, 128  ;;  %p82_p1 = scmp.lt.s32.totalorder %s60_s23, %s60_s23 }
   0x6   :  { %p78_p0 = scmp.ne.s32.totalorder %s60_s23, %s77_s0  ;;  %p83_p2 = scmp.lt.s32.totalorder %s77_s0, %s77_s0 }
   0x7   :  { %73 = vset.pattern.permute.xlu0 %v102_v3  ;;  %75 = vset.pattern.permute.xlu1 %v103_v4 }
   0x8   :  { %29 = vperm.xlu0 %73, %v20_v0   ;;  %35 = vperm.xlu1 %75, %v20_v0   ;;  %p84_p3 = por %p83_p2, %p82_p1 }
   0xa   :  { %p85_p4 = pnand %p84_p3, %p78_p0 }
   0xc   :  { %76 = vset.pattern.permute.xlu0 %v101_v2 }
  0x82   :  { %v42_v6 = vpop.permute.xlu0 %41  ;;  %v25_v8 = vpop.permute.xlu1 %24 }
  0x83   :  { %v44_v7 = vmul.f32 %v42_v6, %v18_v5 }
  0x85   :  { %46 = vrot.lane.b32.xlu1 %v44_v7, %s104_s2 }
  0x87   :  { %v30_v9 = vpop.permute.xlu0 %29  ;;  %v36_v11 = vpop.permute.xlu1 %35 }
  0x88   :  { %v32_v10 = vmul.f32 %v30_v9, %v18_v5  ;;  %v38_v14 = vmul.f32 %v36_v11, %v19_v12 }
  0x8a   :  { %v33_v13 = vadd.f32 %v32_v10, %v25_v8 }
  0x8c   :  { %v39_v15 = vadd.f32 %v38_v14, %v33_v13 }
  0xf7   :  { %v47_v16 = vpop.permute.xlu1 %46 }
  0xf8   :  { %v49_v17 = vadd.f32 %v47_v16, %v39_v15 }
  0xfa   :  { %v50_v18 = vmax.f32 %v49_v17, 0.0 }
  0xfc   :  { %52 = vst.msk [vmem:[#allocation2] sm:$0xff] %vm51_vm0, %v50_v18 }
  0xfd   :  { %88 = shalt.err (!%p85_p4)
}
  0xfe   :  { %s89_s25 = scalar_lea.hbm %s159_s4, 128 }
  0xff   :  { %p90_p5 = scmp.ne.s32.totalorder %s159_s4, %s89_s25  ;;  %p93_p6 = scmp.lt.u32.totalorder %s89_s25, %s159_s4 }
 0x101   :  { %p95_p7 = pnand %p93_p6, %p90_p5 }
 0x103   :  { %98 = shalt.err (!%p95_p7)
}
 0x104   :  { %62 = dma.vmem_to_hbm [thread:$0]  %s60_s23, 128, %s159_s4, [#allocation3]  }
 0x105   :  { %99 = dma.done.wait [#allocation3], 128  }
 0x106   :  { %100 = vsyncadd [#allocation3], 4294967168 }
 0x107   :  { %66 = vsyncpa [#allocation3], 1 }

</bundles_post_ra>
